<compile_context>
chip_gen: v7x
topology: tpu7x:2x2x1
jax: 0.10.0
libtpu: 0.0.40
codegen_flags: <defaults>
</compile_context>

<pallas_src>
import functools

import jax
import jax.numpy as jnp
from jax import lax
from jax.experimental import pallas as pl
from jax.experimental.pallas import tpu as pltpu


def _round_up(n: int, m: int) -> int:
    return ((n + m - 1) // m) * m


def _self_attn_kernel(x_ref, w_ref, gamma_ref, out_ref, *, C, C8p, W, Wp, Bt):
    gamma = gamma_ref[0]                       # scalar, read from SMEM
    w_bf = w_ref[...]                          # (M, C_ext) bf16 fused [Wq|bq; Wk|bk; Wv|bv; ones]

    masked = Wp != W
    if masked:
        # Additive key-padding mask: (1, Wp) row, 0 for valid keys, -1e30 for pad.
        col_ids = lax.broadcasted_iota(jnp.int32, (1, Wp), 1)
        neg_mask = jnp.where(col_ids < W, jnp.float32(0.0), jnp.float32(-1e30))

    def process(bi):
        x_b = x_ref[bi]                        # (C_ext, Wp) f32; rows = [x(C); ones; 0-pad]
        x_bf = x_b.astype(jnp.bfloat16)

        # Fused 1x1-conv projections; biases folded via the ones row of x_ext.
        qkv = jnp.dot(w_bf, x_bf, preferred_element_type=jnp.float32)   # (M, Wp)

        q = qkv[0:C8p]                         # (C8p, Wp); rows >= C8 are exact zeros
        k = qkv[C8p:2 * C8p]                   # (C8p, Wp)
        v_ext = qkv[2 * C8p:2 * C8p + C + 1]   # (C+1, Wp); last row == 1 on valid keys

        # energy[i, j] = sum_c q[c, i] * k[c, j]  (queries on sublanes, keys on lanes)
        energy = lax.dot_general(
            q.astype(jnp.bfloat16), k.astype(jnp.bfloat16),
            dimension_numbers=(((0,), (0,)), ((), ())),
            preferred_element_type=jnp.float32)                          # (Wp, Wp)

        if masked:
            energy = energy + neg_mask

        # Numerically stable UNNORMALIZED softmax numerator (f32 exp; bf16 exp
        # would roughly double EUP throughput on v6e/v7x but not on v5e).
        e_max = jnp.max(energy, axis=-1, keepdims=True)                  # (Wp, 1)
        p = jnp.exp(energy - e_max)                                      # (Wp, Wp)
        p_bf = p.astype(jnp.bfloat16)

        # out_ext[c, i] = sum_j v_ext[c, j] * p[i, j].  The last LHS row is the
        # ones row, so out_ext[C] is the per-query softmax denominator -- free
        # MXU work that replaces a Wp^2 sum reduction.
        out_ext = lax.dot_general(
            v_ext.astype(jnp.bfloat16), p_bf,
            dimension_numbers=(((1,), (1,)), ((), ())),
            preferred_element_type=jnp.float32)                          # (C+1, Wp)

        out_un = out_ext[0:C]                                            # (C, Wp)
        denom = out_ext[C:C + 1]                                         # (1, Wp)

        # Deferred normalization fused with gamma: a (1, Wp) row scale instead
        # of a Wp^2 multiply.  (Fully zero-padded batch rows may produce NaN
        # here; they are sliced off by the wrapper and never read.)
        scale = gamma * pl.reciprocal(denom, approx=True)                # (1, Wp)
        out_ref[bi] = (out_un * scale + x_b[0:C, :]).astype(out_ref.dtype)

    if Bt <= 2:
        for bi in range(Bt):                   # short static unroll only
            process(bi)
    else:
        def body(bi, carry):
            process(bi)
            return carry
        lax.fori_loop(0, Bt, body, 0)          # bounded live ranges for larger Bt


def self_attn_pallas(x, wq, bq, wk, bk, wv, bv, gamma):
    B, C, W = x.shape
    C8 = wq.shape[0]

    Wp = _round_up(W, 128)                     # lane-dense width
    C8p = _round_up(C8, 16)                    # bf16 sublane packing for q/k rows
    C_ext = _round_up(C + 1, 8)                # x channels + ones row (bias fold)
    M = 2 * C8p + C + 1                        # [q | k | v | denominator-ones]

    # Fused, bias-folded projection weight: columns 0:C are the conv weights,
    # column C multiplies the ones row of x_ext (i.e. it is the bias); the last
    # output row reproduces the ones row (softmax denominator helper).
    w_ext = jnp.zeros((M, C_ext), dtype=jnp.float32)
    w_ext = w_ext.at[0:C8, 0:C].set(wq)
    w_ext = w_ext.at[0:C8, C].set(bq)
    w_ext = w_ext.at[C8p:C8p + C8, 0:C].set(wk)
    w_ext = w_ext.at[C8p:C8p + C8, C].set(bk)
    w_ext = w_ext.at[2 * C8p:2 * C8p + C, 0:C].set(wv)
    w_ext = w_ext.at[2 * C8p:2 * C8p + C, C].set(bv)
    w_ext = w_ext.at[2 * C8p + C, C].set(1.0)
    w_bf = w_ext.astype(jnp.bfloat16)          # bf16 MXU operand, f32 accumulation

    # VMEM budget from the actual part (~48 MiB scoped on v7x, ~96 MiB v5e/v6e).
    vmem_cap = 64 * 1024 * 1024                # conservative default (v7x per-core)
    try:
        cap = getattr(pltpu.get_tpu_info(), "vmem_capacity_bytes", None)
        if cap:
            vmem_cap = int(cap)
    except Exception:
        pass
    vmem_limit = min(vmem_cap * 3 // 4, 96 * 1024 * 1024)

    def vmem_bytes(bt):
        io = 2 * bt * C_ext * Wp * 4 + 2 * bt * C * Wp * 4    # double-buffered x/out tiles
        wgt = 2 * M * C_ext * 2                               # double-buffered weights
        attn = (4 + 4 + 2) * Wp * Wp                          # energy f32 + p f32 + p bf16
        rows = (4 * M + 4 * C8p + 2 * (C + 1) + 2 * C_ext + 4 * (C + 1) + 16) * Wp
        return io + wgt + attn + rows + (2 << 20)

    # Batch tile: amortize the ~0.35us/step grid overhead only while per-batch
    # attention work is tiny; keep >= 2 grid steps so v7x's 2 TCs both work.
    if Wp <= 128:
        bt_cap = 8
    elif Wp <= 256:
        bt_cap = 2
    else:
        bt_cap = 1
    bt_cap = min(bt_cap, max(1, (B + 1) // 2))
    Bt = max(1, min(B, bt_cap))
    while Bt > 1 and vmem_bytes(Bt) > vmem_limit:
        Bt -= 1
    if vmem_bytes(Bt) > vmem_limit:
        # TODO(synk): key-tiled flash-style path once even Bt=1 exceeds budget.
        vmem_limit = min(vmem_cap * 9 // 10, vmem_bytes(Bt) + (8 << 20))
    Bp = _round_up(B, Bt)

    # x_ext: [x ; ones ; zero-pad] on channels, zero-padded to (Bp, C_ext, Wp).
    x_ext = jnp.concatenate(
        [x.astype(jnp.float32), jnp.ones((B, 1, W), jnp.float32)], axis=1)
    x_ext = jnp.pad(x_ext, ((0, Bp - B), (0, C_ext - (C + 1)), (0, Wp - W)))

    gamma_s = jnp.asarray(gamma, dtype=jnp.float32).reshape(1)

    kernel = functools.partial(_self_attn_kernel,
                               C=C, C8p=C8p, W=W, Wp=Wp, Bt=Bt)

    grid_spec = pltpu.PrefetchScalarGridSpec(
        num_scalar_prefetch=0,
        grid=(Bp // Bt,),
        in_specs=[
            pl.BlockSpec((Bt, C_ext, Wp), lambda b: (b, 0, 0)),        # x tile
            pl.BlockSpec((M, C_ext), lambda b: (0, 0)),                # fused weights
            pl.BlockSpec(memory_space=pltpu.MemorySpace.SMEM),         # gamma scalar
        ],
        out_specs=pl.BlockSpec((Bt, C, Wp), lambda b: (b, 0, 0)),
    )

    flops = 2 * Bp * (M * C_ext * Wp + C8p * Wp * Wp + (C + 1) * Wp * Wp)
    cost = pl.CostEstimate(
        flops=int(flops),
        transcendentals=int(Bp * Wp * Wp),
        bytes_accessed=int(4 * Bp * (C_ext + C) * Wp + 2 * M * C_ext))

    out_p = pl.pallas_call(
        kernel,
        out_shape=jax.ShapeDtypeStruct((Bp, C, Wp), x.dtype),
        grid_spec=grid_spec,
        compiler_params=pltpu.CompilerParams(
            dimension_semantics=("parallel",),
            vmem_limit_bytes=int(vmem_limit)),
        cost_estimate=cost,
    )(x_ext, w_bf, gamma_s)

    return out_p[:B, :, :W]


def self_attn_reference(x, wq, bq, wk, bk, wv, bv, gamma):
    # Pure-JAX f32 reference mirroring the PyTorch forward.
    q = jnp.einsum('oc,bcw->bow', wq, x) + bq[None, :, None]   # (B, C8, W)
    k = jnp.einsum('oc,bcw->bow', wk, x) + bk[None, :, None]   # (B, C8, W)
    v = jnp.einsum('oc,bcw->bow', wv, x) + bv[None, :, None]   # (B, C,  W)
    energy = jnp.einsum('bcq,bck->bqk', q, k)                  # (B, W, W)
    attention = jax.nn.softmax(energy, axis=-1)
    out = jnp.einsum('bcw,bqw->bcq', v, attention)             # (B, C, W)
    return gamma[0] * out + x


if __name__ == "__main__":
    B, C, W = 2, 32, 16        # in_dim=32 -> C//8 = 4
    C8 = C // 8

    key = jax.random.PRNGKey(0)
    kx, kq, kbq, kk, kbk, kv, kbv = jax.random.split(key, 7)

    x = jax.random.normal(kx, (B, C, W), dtype=jnp.float32)
    wq = jax.random.normal(kq, (C8, C), dtype=jnp.float32) * 0.1
    bq = jax.random.normal(kbq, (C8,), dtype=jnp.float32) * 0.1
    wk = jax.random.normal(kk, (C8, C), dtype=jnp.float32) * 0.1
    bk = jax.random.normal(kbk, (C8,), dtype=jnp.float32) * 0.1
    wv = jax.random.normal(kv, (C, C), dtype=jnp.float32) * 0.1
    bv = jax.random.normal(kbv, (C,), dtype=jnp.float32) * 0.1
    # PyTorch inits gamma to 0 (output == x); use a nonzero value here so the
    # attention path is actually exercised.
    gamma = jnp.array([0.5], dtype=jnp.float32)

    out = self_attn_pallas(x, wq, bq, wk, bk, wv, bv, gamma)
    jax.block_until_ready(out)

    ref = self_attn_reference(x, wq, bq, wk, bk, wv, bv, gamma)
    # bf16 MXU operands (f32 accumulation) + approx reciprocal + bf16-summed
    # softmax denominator -> relaxed tolerance (rows don't sum to exactly 1).
    assert jnp.allclose(out, ref, atol=3e-2, rtol=3e-2), "mismatch vs reference"

    print("KERNEL_OK")
</pallas_src>

<mosaic_0001>
module attributes {stable_mosaic.version = 11 : i64} {
  func.func @_self_attn_kernel(%arg0: i32, %arg1: memref<1x40x128xf32, #tpu.memory_space<vmem>>, %arg2: memref<65x40xbf16, #tpu.memory_space<vmem>>, %arg3: memref<1xf32, #tpu.memory_space<smem>>, %arg4: memref<1x32x128xf32, #tpu.memory_space<vmem>>) attributes {dimension_semantics = [#tpu.dimension_semantics<parallel>], iteration_bounds = array<i64: 2>, scalar_prefetch = 0 : i64, scratch_operands = 0 : i64, tpu.core_type = #tpu.core_type<tc>, window_params = [{transform_indices = @transform_0, window_bounds = array<i64: 1, 40, 128>}, {pipeline_mode = #tpu.pipeline_mode<synchronous>, transform_indices = @transform_1, window_bounds = array<i64: 65, 40>}, {transform_indices = @transform_2, window_bounds = array<i64: 1>}, {transform_indices = @transform_3, window_bounds = array<i64: 1, 32, 128>}]} {
    %c0 = arith.constant 0 : index
    %0 = memref.load %arg3[%c0] : memref<1xf32, #tpu.memory_space<smem>>
    %c0_0 = arith.constant 0 : index
    %c0_1 = arith.constant 0 : index
    %1 = vector.load %arg2[%c0_0, %c0_1] : memref<65x40xbf16, #tpu.memory_space<vmem>>, vector<65x40xbf16>
    %2 = tpu.iota {dimensions = array<i32: 1>} : vector<1x128xi32>
    %c16_i32 = arith.constant 16 : i32
    %3 = vector.broadcast %c16_i32 : i32 to vector<1x128xi32>
    %4 = arith.cmpi slt, %2, %3 : vector<1x128xi32>
    %cst = arith.constant 0.000000e+00 : f32
    %cst_2 = arith.constant -1.000000e+30 : f32
    %5 = vector.broadcast %cst : f32 to vector<1x128xf32>
    %6 = vector.broadcast %cst_2 : f32 to vector<1x128xf32>
    %7 = arith.select %4, %5, %6 : vector<1x128xi1>, vector<1x128xf32>
    %c0_3 = arith.constant 0 : index
    %c0_4 = arith.constant 0 : index
    %c0_5 = arith.constant 0 : index
    %8 = vector.load %arg1[%c0_3, %c0_4, %c0_5] : memref<1x40x128xf32, #tpu.memory_space<vmem>>, vector<1x40x128xf32>
    %9 = vector.shape_cast %8 : vector<1x40x128xf32> to vector<40x128xf32>
    %10 = arith.truncf %9 : vector<40x128xf32> to vector<40x128xbf16>
    %cst_6 = arith.constant dense<0.000000e+00> : vector<65x128xf32>
    %11 = tpu.matmul %1, %10, %cst_6 {dimension_numbers = #tpu.dot_dimension_numbers<[1], [0], [0], [1], [0, 0, 1, 1], [], []>} : vector<65x40xbf16>, vector<40x128xbf16>, vector<65x128xf32> -> vector<65x128xf32>
    %12 = vector.extract_strided_slice %11 {offsets = [0, 0], sizes = [16, 128], strides = [1, 1]} : vector<65x128xf32> to vector<16x128xf32>
    %13 = vector.extract_strided_slice %11 {offsets = [16, 0], sizes = [16, 128], strides = [1, 1]} : vector<65x128xf32> to vector<16x128xf32>
    %14 = vector.extract_strided_slice %11 {offsets = [32, 0], sizes = [33, 128], strides = [1, 1]} : vector<65x128xf32> to vector<33x128xf32>
    %15 = arith.truncf %12 : vector<16x128xf32> to vector<16x128xbf16>
    %16 = arith.truncf %13 : vector<16x128xf32> to vector<16x128xbf16>
    %cst_7 = arith.constant dense<0.000000e+00> : vector<128x128xf32>
    %17 = tpu.matmul %15, %16, %cst_7 {dimension_numbers = #tpu.dot_dimension_numbers<[0], [0], [1], [1], [0, 1, 1, 1], [], []>} : vector<16x128xbf16>, vector<16x128xbf16>, vector<128x128xf32> -> vector<128x128xf32>
    %18 = vector.broadcast %7 : vector<1x128xf32> to vector<128x128xf32>
    %19 = arith.addf %17, %18 : vector<128x128xf32>
    %cst_8 = arith.constant dense<0xFF800000> : vector<128xf32>
    %20 = vector.multi_reduction <maximumf>, %19, %cst_8 [1] : vector<128x128xf32> to vector<128xf32>
    %21 = vector.shape_cast %20 : vector<128xf32> to vector<128x1xf32>
    %22 = vector.broadcast %21 : vector<128x1xf32> to vector<128x128xf32>
    %23 = arith.subf %19, %22 : vector<128x128xf32>
    %24 = math.exp %23 : vector<128x128xf32>
    %25 = arith.truncf %24 : vector<128x128xf32> to vector<128x128xbf16>
    %26 = arith.truncf %14 : vector<33x128xf32> to vector<33x128xbf16>
    %cst_9 = arith.constant dense<0.000000e+00> : vector<33x128xf32>
    %27 = tpu.matmul %26, %25, %cst_9 {dimension_numbers = #tpu.dot_dimension_numbers<[1], [1], [0], [0], [0, 0, 1, 0], [], []>} : vector<33x128xbf16>, vector<128x128xbf16>, vector<33x128xf32> -> vector<33x128xf32>
    %28 = vector.extract_strided_slice %27 {offsets = [0, 0], sizes = [32, 128], strides = [1, 1]} : vector<33x128xf32> to vector<32x128xf32>
    %29 = vector.extract_strided_slice %27 {offsets = [32, 0], sizes = [1, 128], strides = [1, 1]} : vector<33x128xf32> to vector<1x128xf32>
    %30 = tpu.reciprocal %29 {approx = true} : vector<1x128xf32> -> vector<1x128xf32>
    %31 = vector.broadcast %0 : f32 to vector<1x128xf32>
    %32 = arith.mulf %31, %30 : vector<1x128xf32>
    %33 = vector.broadcast %32 : vector<1x128xf32> to vector<32x128xf32>
    %34 = arith.mulf %28, %33 : vector<32x128xf32>
    %35 = vector.extract_strided_slice %9 {offsets = [0, 0], sizes = [32, 128], strides = [1, 1]} : vector<40x128xf32> to vector<32x128xf32>
    %36 = arith.addf %34, %35 : vector<32x128xf32>
    %c0_10 = arith.constant 0 : index
    %c0_11 = arith.constant 0 : index
    %c0_12 = arith.constant 0 : index
    %37 = vector.load %arg4[%c0_10, %c0_11, %c0_12] : memref<1x32x128xf32, #tpu.memory_space<vmem>>, vector<1x32x128xf32>
    %38 = vector.shape_cast %37 : vector<1x32x128xf32> to vector<32x128xf32>
    %39 = vector.shape_cast %36 : vector<32x128xf32> to vector<1x32x128xf32>
    tpu.vector_store %arg4[%c0_10, %c0_11, %c0_12], %39 {strides = array<i32>} : memref<1x32x128xf32, #tpu.memory_space<vmem>>, vector<1x32x128xf32>,
    return
  }
  func.func @transform_0(%arg0: i32) -> (i32, i32, i32) {
    %c0_i32 = arith.constant 0 : i32
    %c0_i32_0 = arith.constant 0 : i32
    %c0_i32_1 = arith.constant 0 : i32
    return %arg0, %c0_i32, %c0_i32_0 : i32, i32, i32
  }
  func.func @transform_1(%arg0: i32) -> (i32, i32) {
    %c0_i32 = arith.constant 0 : i32
    %c0_i32_0 = arith.constant 0 : i32
    %c0_i32_1 = arith.constant 0 : i32
    return %c0_i32, %c0_i32_0 : i32, i32
  }
  func.func @transform_2(%arg0: i32) -> i32 {
    %c0_i32 = arith.constant 0 : i32
    %c0_i32_0 = arith.constant 0 : i32
    return %c0_i32 : i32
  }
  func.func @transform_3(%arg0: i32) -> (i32, i32, i32) {
    %c0_i32 = arith.constant 0 : i32
    %c0_i32_0 = arith.constant 0 : i32
    %c0_i32_1 = arith.constant 0 : i32
    return %arg0, %c0_i32, %c0_i32_0 : i32, i32, i32
  }
}

</mosaic_0001>

<bundles_post_ra>
// kernel: tpu_custom_call.1
= control target key start
LH: loop header
LB: loop body
LE: loop exit
PB: predicated region body
PF: predicated region fallthrough
CT: control target
= control target key end

     0   :  { %s1409_s0 = inlined_call_operand.hbm [shape: f32[2,40,128], index: 0, kind: input, shape index: {}]   ;;  %s1410_s1 = inlined_call_operand.vmem [shape: bf16[65,40], index: 1, kind: input, shape index: {}]   ;;  %s1411_s2 = inlined_call_operand.<no memory space> [shape: f32[1], index: 2, kind: input, shape index: {}]   ;;  %s1412_s3 = inlined_call_operand.hbm [shape: f32[2,32,128], index: 3, kind: output, shape index: {}]  }
   0x1   :  { %8 = sst [smem:[#allocation2]] %s1411_s2 }
   0x2   :  { %9 = vsyncpa [#allocation4], 0 }
   0x3   :  { %11 = vsyncpa [#allocation4 + $0x1], 0 }
   0x4   :  { %12 = vsyncpa [#allocation5], 0 }
   0x5   :  { %14 = vsyncpa [#allocation5 + $0x1], 0  ;;  %s1093_s14 = smov 0   ;;  %s1095_s15 = smov 0  }
   0x6   :  { %s1097_s16 = smov 0   ;;  %s1099_s17 = smov 0  }
   0x7 LB: > { %s1114_s2 = sadd.s32 4294967295, %s1059_s17   ;;  %s721_s18 = sadd.s32 4294967294, %s1059_s17   ;;  %s1059_s17 = sphi %s1099_s17, %s1424_s17   ;;  %s1055_s16 = sphi %s1097_s16, %s1423_s16   ;;  %s1051_s15 = sphi %s1095_s15, %s1422_s15   ;;  %s1047_s14 = sphi %s1093_s14, %s1421_s14  }
   0x8   : > { %s1118_s19 = sadd.s32 1, %s1059_s17   ;;  %s27_s20 = sadd.s32 1, %s1055_s16 }
   0x9   : > { %s24_s21 = ssub.s32 %s1059_s17, %s1118_s19  ;;  %p34_p0 = scmp.ne.s32.totalorder %s1055_s16, %s1051_s15 }
   0xa   : > { %p25_p1 = scmp.eq.s32.totalorder %s24_s21, 0  ;;  %p35_p2 = scmp.eq.s32.totalorder %s1059_s17, 0 }
   0xb   : > { %p40_p3 = scmp.ne.s32.totalorder %s1051_s15, %s1047_s14  ;;  %p41_p4 = scmp.eq.s32.totalorder %s1114_s2, 0 }
   0xc   : > { %s1130_s22 = scalar_select %p25_p1, %s1055_s16, %s27_s20  }
   0xd   : > { %p36_p5 = por %p35_p2, %p34_p0  ;;  %p1132_p6 = por %p41_p4, %p40_p3 }
   0xe   : > { %p106_p7 = scmp.eq.s32.totalorder %s1114_s2, 1  ;;  %p112_p8 = scmp.eq.s32.totalorder %s721_s18, 1 }
   0xf   : > { %p882_p10 = scmp.lt.s32.totalorder %s1059_s17, 2  ;;  %s138_s26 = sand.u32 1, %s1055_s16  }
  0x10   : > { %p1139_p11 = por %p106_p7, %p34_p0  ;;  %p1143_p12 = por %p112_p8, %p40_p3 }
  0x11   : > { %s868_s27 = smul.u32 640, %s1059_s17  ;;  %p1154_p13 = pnand %p882_p10, %p36_p5 }
  0x12   : > { %s1415_s24 = scalar_select %p1139_p11, 1, 0 }
  0x13   : > { %s1416_s25 = scalar_select %p1143_p12, 1, 0 }
  0x14   : > { %s867_s28 = smul.u32 40, %s138_s26  ;;  %s1152_s4 = scalar_lea.hbm %s1409_s0, %s868_s27 }
  0x15   : > { %s1160_s8 = scalar_lea.sflag [#allocation4], %s138_s26  ;;  %s963_s9 = scalar_lea.hbm %s1152_s4, 640 }
  0x16   : > { %s142_s6 = scalar_lea.vmem [#allocation3], %s867_s28  ;;  %p964_p0 = scmp.ne.s32.totalorder %s1152_s4, %s963_s9 }
  0x17   : > { %s149_s7 = sshll.u32 %s142_s6, 4  ;;  %p965_p1 = pneg %p1154_p13  ;;  %s1158_s7 = int_to_ptr.vmem [resolvable:$true] %s149_s7 }
  0x18   : > { %s968_s12 = scalar_lea.hbm %s1409_s0, 1280  ;;  %p969_p4 = scmp.lt.u32.totalorder %s1152_s4, %s1409_s0 }
  0x19   : > { %p966_p2 = pnand %p965_p1, %p964_p0  ;;  %p970_p5 = scmp.lt.u32.totalorder %s968_s12, %s963_s9 }
  0x1a   : > { %p972_p8 = scmp.lt.u32.totalorder %s963_s9, %s1152_s4 }
  0x1b   : > { %p967_p3 = pneg %p966_p2  ;;  %p971_p7 = por %p970_p5, %p969_p4 }
  0x1d   : > { %p973_p10 = por %p972_p8, %p971_p7 }
  0x1f   : > { %p974_p9 = pnand %p973_p10, %p967_p3 }
  0x21   : > { %977 = shalt.err (!%p974_p9)
}
  0x22   : > { %s978_s20 = scalar_lea.vmem %s1158_s7, 640  ;;  %s1061_s21 = smov [#allocation3]  }
  0x23   : > { %p979_p0 = scmp.ne.s32.totalorder %s1158_s7, %s978_s20  ;;  %s983_s26 = sshll.u32 %s1061_s21, 4  ;;  %s984_s26 = int_to_ptr.vmem [resolvable:$false] %s983_s26 }
  0x24   : > { %s985_s27 = scalar_lea.vmem %s984_s26, 1280  ;;  %p986_p11 = scmp.lt.s32.totalorder %s1158_s7, %s984_s26 }
  0x25   : > { %p981_p2 = pnand %p979_p0, %p965_p1  ;;  %p987_p4 = scmp.lt.s32.totalorder %s985_s27, %s978_s20 }
  0x27   : > { %p982_p12 = pneg %p981_p2  ;;  %p988_p5 = por %p987_p4, %p986_p11 }
  0x29   : > { %p989_p7 = pnand %p988_p5, %p982_p12 }
  0x2b   : > { %992 = shalt.err (!%p989_p7)
}
  0x2c   : > { %s1062_s28 = smov 128   ;;  %s1063_s29 = smov 8  }
  0x2d   : > { %877 = dma.hbm_to_vmem [thread:$0]  (!%p1154_p13), %s1152_s4, 640, %s1158_s7, %s1160_s8, %s1062_s28, %s1062_s28, %s1063_s29  }
  0x2e   : > { %p725_p9 = scmp.ge.s32.totalorder %s1059_s17, 1  ;;  %p157_p1 = scmp.lt.s32.totalorder %s1059_s17, 3 }
  0x30   : > { %p158_p3 = pnand %p725_p9, %p157_p1 }
  0x31   : > { %s1191_s30 = sand.u32 (!%p158_p3), 1, %s1051_s15  }
  0x32   : > { %161 = sbr.rel (%p158_p3) target bundleno = 1089 (0x441), region = 32  ;;  %s164_s9 = scalar_lea.sflag (!%p158_p3), [#allocation4], %s1191_s30 }
  0x33   : > { %s869_s6 = smul.u32 (!%p158_p3), 40, %s1191_s30 }
  0x35   : > { %s167_s10 = scalar_lea.vmem (!%p158_p3), [#allocation3], %s869_s6 }
  0x39   : > { %1038 = dma.done.wait (%p1132_p6), %s164_s9, 640  }
  0x3a   : > { %1040 = vsyncadd (%p1132_p6), %s164_s9, 4294966656  ;;  %v1064_v0 = vmov 0.0   ;;  %vm1065_vm0 = vmmov 0   ;;  %v1202_v1 = vld [vmem:[%s167_s10] sm:$0xff]  ;;  %v1204_v2 = vld [vmem:[%s167_s10 + $0x8] sm:$0xff]  ;;  %vm252_vm1 = vcmask 1043456   ;;  %v201_v33 = vlaneseq }
  0x3b   : > { %779 = vmatprep.subr.bf16.mxu0 %v1064_v0  ;;  %785 = vmatprep.mubr.msk.bf16.mxu0 %vm1065_vm0, %v1064_v0  ;;  %v1206_v3 = vld [vmem:[%s167_s10 + $0x10] sm:$0xff]  ;;  %v210_v4 = vpack.c.bf16 %v1204_v2, %v1202_v1  ;;  %v1210_v5 = vld [vmem:[%s167_s10 + $0x18] sm:$0xff]  ;;  %v209_v6 = vld [vmem:[%s167_s10 + $0x20] sm:$0xff]  ;;  %vm236_vm2 = vcmask 326656   ;;  %vm346_vm3 = vcmask 130048   ;;  %s191_s21 = sld [smem:[#allocation2]] }
  0x3c   : > { %v211_v7 = vpack.c.bf16 %v1210_v5, %v1206_v3  ;;  %v212_v8 = vpack.c.bf16 %v209_v6, %v209_v6  ;;  %v924_v10 = vld [vmem:[%s1410_s1] sm:$0xff]   ;;  %v925_v11 = vld [vmem:[%s1410_s1 + $0x8] sm:$0xff]   ;;  %v926_v30 = vld [vmem:[%s1410_s1 + $0x10] sm:$0xff]   ;;  %v202_v34 = vand.u32 127, %v201_v33  ;;  %v1066_v35 = vmov -1e+30  }
  0x3d   : > { %780 = vmatpush3.bf16.msra.mxu0 %v210_v4  ;;  %v927_v31 = vld [vmem:[%s1410_s1 + $0x18] sm:$0xff]   ;;  %v928_v32 = vld [vmem:[%s1410_s1 + $0x20] ss:$0 sps:$4 sm:$0x11]   ;;  %s726_s26 = sshll.u32 %s1191_s30, 5  ;;  %s750_s27 = sshll.u32 %s1114_s2, 9 }
  0x3e   : > { %781 = vmatprep.subr.bf16.mxu0 %v1064_v0  ;;  %v254_v9 = vsel %vm252_vm1, %v212_v8, 0  ;;  %vm203_vm4 = vcmp.lt.s32.totalorder %v202_v34, 16  ;;  %s189_s28 = scalar_lea.vmem [#allocation6], %s726_s26  ;;  %s1359_s10 = scalar_lea.hbm %s1412_s3, %s750_s27 }
  0x3f   : > { %v204_v36 = vsel %vm203_vm4, 0.0, %v1066_v35  ;;  %s648_s29 = sshll.u32 %s189_s28, 4  ;;  %s635_s2 = scalar_lea.sflag [#allocation5], %s1191_s30  ;;  %s1361_s29 = int_to_ptr.vmem [resolvable:$true] %s648_s29 }
  0x40   : > { %s993_s23 = scalar_lea.vmem %s1361_s29, 512  ;;  %p1418_p11 = scmp.ne.s32.totalorder %s1415_s24, 0 }
  0x41   : > { %782 = vmatpush3.bf16.msra.mxu0 %v211_v7  ;;  %p994_p6 = scmp.ne.s32.totalorder %s1361_s29, %s993_s23  ;;  %s1067_s4 = smov [#allocation6]  }
  0x42   : > { %783 = vmatprep.subr.bf16.mxu0 %v1064_v0  ;;  %s997_s5 = sshll.u32 %s1067_s4, 4  ;;  %s998_s5 = int_to_ptr.vmem [resolvable:$false] %s997_s5 }
  0x43   : > { %p995_p12 = pnand %p994_p6, %p1418_p11  ;;  %s999_s7 = scalar_lea.vmem %s998_s5, 1024 }
  0x44   : > { %p1000_p8 = scmp.lt.s32.totalorder %s1361_s29, %s998_s5  ;;  %p1001_p10 = scmp.lt.s32.totalorder %s999_s7, %s993_s23 }
  0x45   : > { %784 = vmatpush3.bf16.msra.mxu0 %v254_v9  ;;  %p996_p13 = pneg %p995_p12 }
  0x46   : > { %823 = vmatprep.subr.bf16.mxu0 %v1064_v0  ;;  %p1002_p0 = por %p1001_p10, %p1000_p8 }
  0x48   : > { %786 = vmatmul.mubr.msk.bf16.vlgmr.msra.gmra.mrb[0].mxu0 %vm236_vm2, %v924_v10  ;;  %p1003_p2 = pnand %p1002_p0, %p996_p13 }
  0x49   : > { %789 = vmatprep.mubr.msk.bf16.mxu0 %vm1065_vm0, %v1064_v0 }
  0x50   : > { %790 = vmatmul.mubr.msk.bf16.gmra.mrb[4].mxu0 %vm236_vm2, %v925_v11 }
  0x51   : > { %793 = vmatprep.mubr.msk.bf16.mxu0 %vm1065_vm0, %v1064_v0 }
  0x58   : > { %794 = vmatmul.mubr.msk.bf16.gmra.mrb[8].mxu0 %vm236_vm2, %v926_v30 }
  0x59   : > { %797 = vmatprep.mubr.msk.bf16.mxu0 %vm1065_vm0, %v1064_v0 }
  0x60   : > { %798 = vmatmul.mubr.msk.bf16.gmra.mrb[12].mxu0 %vm236_vm2, %v927_v31 }
  0x61   : > { %801 = vmatprep.mubr.msk.bf16.mxu0 %vm1065_vm0, %v1064_v0 }
  0x68   : > { %802 = vmatmul.mubr.msk.bf16.gmra.mrb[16].mxu0 %vm236_vm2, %v928_v32 }
  0x69   : > { %839 = vmatprep.mubr.msk.bf16.mxu0 %vm1065_vm0, %v1064_v0 }
 0x11b   : > { %v290_v12 = vpop.f32.mrb[0].mxu0 }
 0x11c   : > { %v787_v13 = vpop.f32.mrb[1].mxu0 }
 0x11d   : > { %v293_v14 = vpop.f32.mrb[2].mxu0 }
 0x11e   : > { %v788_v15 = vpop.f32.mrb[3].mxu0  ;;  %v328_v16 = vpack.c.bf16 %v293_v14, %v290_v12 }
 0x120   : > { %330 = vxpose.xlu0.c.b16.start.end [1/1] (short) %v328_v16, 128 }
 0x123   : > { %v298_v17 = vpop.f32.mrb[4].mxu0 }
 0x124   : > { %v791_v18 = vpop.f32.mrb[5].mxu0 }
 0x125   : > { %v301_v19 = vpop.f32.mrb[6].mxu0 }
 0x126   : > { %v329_v20 = vpack.c.bf16 %v301_v19, %v298_v17  ;;  %v792_v21 = vpop.f32.mrb[7].mxu0 }
 0x128   : > { %805 = vmatprep.subr.bf16.mxu1 %v329_v20 }
 0x129   : > { %806 = vmatpush3.bf16.msra.mxu1 %v329_v20 }
 0x12a   : > { %851 = vmatprep.subr.bf16.mxu1 %v1064_v0 }
 0x12b   : > { %v1301_v10 = vpop.f32.mrb[8].mxu0 }
 0x12c   : > { %v795_v11 = vpop.f32.mrb[9].mxu0 }
 0x12d   : > { %v1303_v12 = vpop.f32.mrb[10].mxu0 }
 0x12e   : > { %v556_v13 = vpack.c.bf16 %v1303_v12, %v1301_v10  ;;  %v796_v14 = vpop.f32.mrb[11].mxu0 }
 0x133   : > { %v1307_v15 = vpop.f32.mrb[12].mxu0 }
 0x134   : > { %v799_v16 = vpop.f32.mrb[13].mxu0 }
 0x135   : > { %v1309_v17 = vpop.f32.mrb[14].mxu0 }
 0x136   : > { %v557_v18 = vpack.c.bf16 %v1309_v17, %v1307_v15  ;;  %v800_v19 = vpop.f32.mrb[15].mxu0 }
 0x13b   : > { %v1313_v20 = vpop.f32.mrb[16].mxu0 }
 0x13c   : > { %v803_v21 = vpop.f32.mrb[17].mxu0 }
 0x186   : > { %v338_v22 = vpop.trf.xlu0 }
 0x187   : > { %807 = vmatprep.mubr.msk.bf16.mxu1 %vm346_vm3, %v338_v22  ;;  %v325_v22 = vpop.f32.mrb[18].mxu0 }
 0x18a   : > { %v339_v23 = vpop.trf.xlu0 }
 0x18b   : > { %808 = vmatmul.mubr.msk.bf16.vlgmr.msra.gmra.mrb[0].mxu1 %vm346_vm3, %v339_v23  ;;  %v804_v23 = vpop.f32.mrb[19].mxu0 }
 0x18e   : > { %v340_v24 = vpop.trf.xlu0 }
 0x18f   : > { %811 = vmatprep.mubr.msk.bf16.mxu1 %vm346_vm3, %v340_v24 }
 0x192   : > { %v341_v25 = vpop.trf.xlu0 }
 0x193   : > { %812 = vmatmul.mubr.msk.bf16.gmra.mrb[4].mxu1 %vm346_vm3, %v341_v25 }
 0x196   : > { %v342_v26 = vpop.trf.xlu0 }
 0x197   : > { %815 = vmatprep.mubr.msk.bf16.mxu1 %vm346_vm3, %v342_v26 }
 0x19a   : > { %v343_v27 = vpop.trf.xlu0 }
 0x19b   : > { %816 = vmatmul.mubr.msk.bf16.gmra.mrb[8].mxu1 %vm346_vm3, %v343_v27 }
 0x19e   : > { %v344_v28 = vpop.trf.xlu0 }
 0x19f   : > { %819 = vmatprep.mubr.msk.bf16.mxu1 %vm346_vm3, %v344_v28 }
 0x1a2   : > { %v345_v29 = vpop.trf.xlu0 }
 0x1a3   : > { %820 = vmatmul.mubr.msk.bf16.gmra.mrb[12].mxu1 %vm346_vm3, %v345_v29 }
 0x1a4   : > { %843 = vmatprep.mubr.msk.bf16.mxu1 %vm1065_vm0, %v1064_v0 }
 0x25e   : > { %v809_v37 = vpop.f32.mrb[0].mxu1 }
 0x25f   : > { %v405_v38 = vpop.f32.mrb[1].mxu1  ;;  %v1262_v43 = vadd.f32 %v809_v37, %v204_v36 }
 0x260   : > { %v1259_v39 = vadd.f32 %v405_v38, %v204_v36  ;;  %v810_v40 = vpop.f32.mrb[2].mxu1 }
 0x261   : > { %v408_v41 = vpop.f32.mrb[3].mxu1  ;;  %v417_v48 = vadd.f32 %v810_v40, %v204_v36 }
 0x262   : > { %v409_v42 = vadd.f32 %v408_v41, %v204_v36  ;;  %468 = vmax.xlane.f32.xlu0 %v1259_v39 }
 0x264   : > { %470 = vmax.xlane.f32.xlu1 %v409_v42 }
 0x266   : > { %v813_v44 = vpop.f32.mrb[4].mxu1 }
 0x267   : > { %v421_v45 = vpop.f32.mrb[5].mxu1  ;;  %v1271_v55 = vadd.f32 %v813_v44, %v204_v36 }
 0x268   : > { %472 = vmax.xlane.f32.xlu1 %v1262_v43  ;;  %v814_v46 = vpop.f32.mrb[6].mxu1  ;;  %v1265_v49 = vadd.f32 %v421_v45, %v204_v36 }
 0x269   : > { %v424_v47 = vpop.f32.mrb[7].mxu1  ;;  %v1274_v60 = vadd.f32 %v814_v46, %v204_v36 }
 0x26a   : > { %v1268_v54 = vadd.f32 %v424_v47, %v204_v36 }
 0x26c   : > { %474 = vmax.xlane.f32.xlu1 %v417_v48 }
 0x26e   : > { %v817_v50 = vpop.f32.mrb[8].mxu1 }
 0x26f   : > { %v437_v51 = vpop.f32.mrb[9].mxu1  ;;  %v1289_v6 = vadd.f32 %v817_v50, %v204_v36 }
 0x270   : > { %476 = vmax.xlane.f32.xlu1 %v1265_v49  ;;  %v818_v52 = vpop.f32.mrb[10].mxu1  ;;  %v1278_v62 = vadd.f32 %v437_v51, %v204_v36 }
 0x271   : > { %v440_v53 = vpop.f32.mrb[11].mxu1  ;;  %v1292_v7 = vadd.f32 %v818_v52, %v204_v36 }
 0x272   : > { %v1286_v4 = vadd.f32 %v440_v53, %v204_v36 }
 0x274   : > { %478 = vmax.xlane.f32.xlu1 %v1268_v54 }
 0x276   : > { %v821_v56 = vpop.f32.mrb[12].mxu1 }
 0x277   : > { %v453_v57 = vpop.f32.mrb[13].mxu1  ;;  %v1298_v9 = vadd.f32 %v821_v56, %v204_v36 }
 0x278   : > { %v822_v58 = vpop.f32.mrb[14].mxu1  ;;  %480 = vmax.xlane.f32.xlu1 %v1271_v55  ;;  %v1294_v8 = vadd.f32 %v453_v57, %v204_v36 }
 0x279   : > { %v456_v59 = vpop.f32.mrb[15].mxu1  ;;  %v1280_v63 = vadd.f32 %v822_v58, %v204_v36 }
 0x27a   : > { %v1276_v61 = vadd.f32 %v456_v59, %v204_v36 }
 0x27c   : > { %482 = vmax.xlane.f32.xlu1 %v1274_v60  ;;  %494 = vmax.xlane.f32.xlu0 %v1276_v61 }
 0x280   : > { %484 = vmax.xlane.f32.xlu1 %v1278_v62  ;;  %498 = vmax.xlane.f32.xlu0 %v1280_v63 }
 0x284   : > { %486 = vmax.xlane.f32.xlu1 %v1286_v4 }
 0x288   : > { %488 = vmax.xlane.f32.xlu1 %v1289_v6 }
 0x28c   : > { %490 = vmax.xlane.f32.xlu1 %v1292_v7 }
 0x290   : > { %492 = vmax.xlane.f32.xlu1 %v1294_v8 }
 0x294   : > { %496 = vmax.xlane.f32.xlu1 %v1298_v9 }
 0x2ef   : > { %v469_v24 = vpop.xlane.xlu0 %468 }
 0x2f0   : > { %v500_v25 = vsub.f32 %v1259_v39, %v469_v24 }
 0x2f1   : > { %v471_v26 = vpop.xlane.xlu1 %470 }
 0x2f2   : > { %v516_v27 = vmul.f32 1.442695, %v500_v25  ;;  %v501_v28 = vsub.f32 %v409_v42, %v471_v26 }
 0x2f4   : > { %v518_v29 = vmul.f32 1.442695, %v501_v28  ;;  %929 = vpow2.f32 %v516_v27 }
 0x2f5   : > { %v473_v30 = vpop.xlane.xlu1 %472 }
 0x2f6   : > { %931 = vpow2.f32 %v518_v29  ;;  %v502_v31 = vsub.f32 %v1262_v43, %v473_v30 }
 0x2f8   : > { %v520_v32 = vmul.f32 1.442695, %v502_v31 }
 0x2f9   : > { %v475_v34 = vpop.xlane.xlu1 %474 }
 0x2fa   : > { %v503_v35 = vsub.f32 %v417_v48, %v475_v34  ;;  %933 = vpow2.f32 %v520_v32 }
 0x2fc   : > { %v522_v36 = vmul.f32 1.442695, %v503_v35 }
 0x2fd   : > { %v477_v37 = vpop.xlane.xlu1 %476 }
 0x2fe   : > { %935 = vpow2.f32 %v522_v36  ;;  %v504_v38 = vsub.f32 %v1265_v49, %v477_v37  ;;  %v930_v40 = vpop.eup %929 }
 0x300   : > { %v932_v39 = vpop.eup %931  ;;  %v524_v41 = vmul.f32 1.442695, %v504_v38 }
 0x301   : > { %v479_v44 = vpop.xlane.xlu1 %478  ;;  %v548_v42 = vpack.c.bf16 %v932_v39, %v930_v40 }
 0x302   : > { %v505_v45 = vsub.f32 %v1268_v54, %v479_v44  ;;  %937 = vpow2.f32 %v524_v41 }
 0x303   : > { %824 = vmatpush3.bf16.xpose.msra.mxu0 %v548_v42  ;;  %859 = vmatpush3.bf16.xpose.msra.mxu1 %v548_v42 }
 0x304   : > { %v526_v46 = vmul.f32 1.442695, %v505_v45  ;;  %825 = vmatprep.subr.bf16.mxu0 %v1064_v0  ;;  %852 = vmatprep.subr.bf16.mxu1 %v1064_v0  ;;  %v934_v48 = vpop.eup %933 }
 0x305   : > { %v481_v43 = vpop.xlane.xlu1 %480 }
 0x306   : > { %939 = vpow2.f32 %v526_v46  ;;  %v506_v47 = vsub.f32 %v1271_v55, %v481_v43  ;;  %v558_v43 = vpack.c.bf16 %v1313_v20, %v1313_v20  ;;  %v616_v20 = vstv %s191_s21 }
 0x308   : > { %v936_v49 = vpop.eup %935  ;;  %v528_v50 = vmul.f32 1.442695, %v506_v47 }
 0x309   : > { %v483_v51 = vpop.xlane.xlu1 %482  ;;  %v549_v52 = vpack.c.bf16 %v936_v49, %v934_v48 }
 0x30a   : > { %v507_v53 = vsub.f32 %v1274_v60, %v483_v51  ;;  %941 = vpow2.f32 %v528_v50 }
 0x30b   : > { %826 = vmatpush3.bf16.xpose.msra.mxu0 %v549_v52  ;;  %860 = vmatpush3.bf16.xpose.msra.mxu1 %v549_v52 }
 0x30c   : > { %v530_v54 = vmul.f32 1.442695, %v507_v53  ;;  %827 = vmatprep.subr.bf16.mxu0 %v1064_v0  ;;  %853 = vmatprep.subr.bf16.mxu1 %v1064_v0  ;;  %v938_v55 = vpop.eup %937 }
 0x30d   : > { %v485_v56 = vpop.xlane.xlu1 %484 }
 0x30e   : > { %943 = vpow2.f32 %v530_v54  ;;  %v508_v57 = vsub.f32 %v1278_v62, %v485_v56 }
 0x310   : > { %v940_v58 = vpop.eup %939  ;;  %v532_v59 = vmul.f32 1.442695, %v508_v57 }
 0x311   : > { %v487_v11 = vpop.xlane.xlu1 %486  ;;  %v550_v14 = vpack.c.bf16 %v940_v58, %v938_v55 }
 0x312   : > { %v509_v16 = vsub.f32 %v1286_v4, %v487_v11  ;;  %945 = vpow2.f32 %v532_v59  ;;  %v495_v4 = vpop.xlane.xlu0 %494 }
 0x313   : > { %828 = vmatpush3.bf16.xpose.msra.mxu0 %v550_v14  ;;  %861 = vmatpush3.bf16.xpose.msra.mxu1 %v550_v14  ;;  %v513_v29 = vsub.f32 %v1276_v61, %v495_v4 }
 0x314   : > { %v534_v60 = vmul.f32 1.442695, %v509_v16  ;;  %829 = vmatprep.subr.bf16.mxu0 %v1064_v0  ;;  %854 = vmatprep.subr.bf16.mxu1 %v1064_v0  ;;  %v942_v62 = vpop.eup %941 }
 0x315   : > { %v489_v19 = vpop.xlane.xlu1 %488  ;;  %v542_v35 = vmul.f32 1.442695, %v513_v29 }
 0x316   : > { %947 = vpow2.f32 %v534_v60  ;;  %v510_v21 = vsub.f32 %v1289_v6, %v489_v19  ;;  %v499_v36 = vpop.xlane.xlu0 %498 }
 0x317   : > { %v515_v61 = vsub.f32 %v1280_v63, %v499_v36 }
 0x318   : > { %v944_v22 = vpop.eup %943  ;;  %v536_v23 = vmul.f32 1.442695, %v510_v21 }
 0x319   : > { %v491_v24 = vpop.xlane.xlu1 %490  ;;  %v551_v25 = vpack.c.bf16 %v944_v22, %v942_v62  ;;  %v546_v41 = vmul.f32 1.442695, %v515_v61 }
 0x31a   : > { %v511_v26 = vsub.f32 %v1292_v7, %v491_v24  ;;  %949 = vpow2.f32 %v536_v23 }
 0x31b   : > { %830 = vmatpush3.bf16.xpose.msra.mxu0 %v551_v25  ;;  %862 = vmatpush3.bf16.xpose.msra.mxu1 %v551_v25 }
 0x31c   : > { %v538_v27 = vmul.f32 1.442695, %v511_v26  ;;  %831 = vmatprep.subr.bf16.mxu0 %v1064_v0  ;;  %855 = vmatprep.subr.bf16.mxu1 %v1064_v0  ;;  %v946_v30 = vpop.eup %945 }
 0x31d   : > { %v493_v28 = vpop.xlane.xlu1 %492 }
 0x31e   : > { %951 = vpow2.f32 %v538_v27  ;;  %v512_v6 = vsub.f32 %v1294_v8, %v493_v28 }
 0x320   : > { %v948_v31 = vpop.eup %947  ;;  %v540_v32 = vmul.f32 1.442695, %v512_v6 }
 0x321   : > { %v497_v34 = vpop.xlane.xlu1 %496  ;;  %v552_v7 = vpack.c.bf16 %v948_v31, %v946_v30 }
 0x322   : > { %953 = vpow2.f32 %v540_v32  ;;  %v514_v37 = vsub.f32 %v1298_v9, %v497_v34 }
 0x323   : > { %832 = vmatpush3.bf16.xpose.msra.mxu0 %v552_v7  ;;  %863 = vmatpush3.bf16.xpose.msra.mxu1 %v552_v7  ;;  %955 = vpow2.f32 %v542_v35 }
 0x324   : > { %833 = vmatprep.subr.bf16.mxu0 %v1064_v0  ;;  %856 = vmatprep.subr.bf16.mxu1 %v1064_v0  ;;  %v950_v8 = vpop.eup %949  ;;  %v544_v40 = vmul.f32 1.442695, %v514_v37 }
 0x326   : > { %957 = vpow2.f32 %v544_v40 }
 0x327   : > { %959 = vpow2.f32 %v546_v41 }
 0x328   : > { %v952_v38 = vpop.eup %951 }
 0x329   : > { %v553_v39 = vpack.c.bf16 %v952_v38, %v950_v8 }
 0x32b   : > { %834 = vmatpush3.bf16.xpose.msra.mxu0 %v553_v39  ;;  %864 = vmatpush3.bf16.xpose.msra.mxu1 %v553_v39 }
 0x32c   : > { %835 = vmatprep.subr.bf16.mxu0 %v1064_v0  ;;  %857 = vmatprep.subr.bf16.mxu1 %v1064_v0  ;;  %v954_v9 = vpop.eup %953 }
 0x32d   : > { %v956_v44 = vpop.eup %955 }
 0x32e   : > { %v554_v42 = vpack.c.bf16 %v956_v44, %v954_v9 }
 0x330   : > { %v958_v63 = vpop.eup %957 }
 0x331   : > { %v960_v45 = vpop.eup %959 }
 0x332   : > { %v555_v46 = vpack.c.bf16 %v960_v45, %v958_v63 }
 0x333   : > { %836 = vmatpush3.bf16.xpose.msra.mxu0 %v554_v42  ;;  %865 = vmatpush3.bf16.xpose.msra.mxu1 %v554_v42 }
 0x334   : > { %837 = vmatprep.subr.bf16.mxu0 %v1064_v0  ;;  %858 = vmatprep.subr.bf16.mxu1 %v1064_v0 }
 0x33b   : > { %838 = vmatpush3.bf16.xpose.msra.mxu0 %v555_v46  ;;  %866 = vmatpush3.bf16.xpose.msra.mxu1 %v555_v46 }
 0x342   : > { %840 = vmatmul.mubr.bf16.vlgmr.msra.gmra.mrb[20].mxu0 %v556_v13  ;;  %844 = vmatmul.mubr.bf16.vlgmr.msra.gmra.mrb[16].mxu1 %v557_v18  ;;  %v619_v18 = vshrl.u32 %v201_v33, 7 }
 0x343   : > { %847 = vmatprep.mubr.msk.bf16.mxu1 %vm1065_vm0, %v1064_v0 }
 0x344   : > { %v620_v53 = vsub.s32 0, %v619_v18 }
 0x34a   : > { %848 = vmatmul.mubr.bf16.gmra.mrb[20].mxu1 %v558_v43 }
 0x415   : > { %v593_v47 = vpop.f32.mrb[20].mxu0  ;;  %v601_v48 = vpop.f32.mrb[16].mxu1 }
 0x416   : > { %v841_v49 = vpop.f32.mrb[21].mxu0  ;;  %v845_v50 = vpop.f32.mrb[17].mxu1 }
 0x417   : > { %v596_v51 = vpop.f32.mrb[22].mxu0  ;;  %v604_v52 = vpop.f32.mrb[18].mxu1 }
 0x418   : > { %v842_v10 = vpop.f32.mrb[23].mxu0  ;;  %v846_v12 = vpop.f32.mrb[19].mxu1 }
 0x41d   : > { %v609_v13 = vpop.f32.mrb[20].mxu1 }
 0x41e   : > { %961 = vrcp.f32 %v609_v13  ;;  %v849_v15 = vpop.f32.mrb[21].mxu1 }
 0x41f   : > { %v612_v17 = vpop.f32.mrb[22].mxu1 }
 0x420   : > { %v850_v0 = vpop.f32.mrb[23].mxu1 }
 0x428   : > { %v962_v54 = vpop.eup %961 }
 0x429   : > { %v617_v56 = vmul.f32 %v962_v54, %v616_v20 }
 0x42b   : > { %v621_v57 = vrot.slane %v617_v56, %v620_v53 }
 0x42d   : > { %v622_v55 = vmul.f32 %v621_v57, %v593_v47  ;;  %v623_v58 = vmul.f32 %v621_v57, %v596_v51  ;;  %v624_v59 = vmul.f32 %v621_v57, %v601_v48  ;;  %v625_v11 = vmul.f32 %v621_v57, %v604_v52 }
 0x42f   : > { %v626_v33 = vadd.f32 %v622_v55, %v1202_v1  ;;  %v627_v14 = vadd.f32 %v623_v58, %v1204_v2  ;;  %v628_v16 = vadd.f32 %v624_v59, %v1206_v3  ;;  %v629_v60 = vadd.f32 %v625_v11, %v1210_v5 }
 0x431   : > { %630 = vst [vmem:[%s189_s28] sm:$0xff] %v626_v33  ;;  %631 = vst [vmem:[%s189_s28 + $0x8] sm:$0xff] %v627_v14 }
 0x432   : > { %632 = vst [vmem:[%s189_s28 + $0x10] sm:$0xff] %v628_v16  ;;  %633 = vst [vmem:[%s189_s28 + $0x18] sm:$0xff] %v629_v60 }
 0x433   : > { %1006 = shalt.err (!%p1003_p2)
}
 0x434   : > { %s1007_s8 = scalar_lea.hbm %s1359_s10, 512  ;;  %s1011_s13 = scalar_lea.hbm %s1412_s3, 1024 }
 0x435   : > { %p1008_p4 = scmp.ne.s32.totalorder %s1359_s10, %s1007_s8  ;;  %p1012_p9 = scmp.lt.u32.totalorder %s1359_s10, %s1412_s3 }
 0x436   : > { %p1013_p1 = scmp.lt.u32.totalorder %s1011_s13, %s1007_s8  ;;  %p1015_p6 = scmp.lt.u32.totalorder %s1007_s8, %s1359_s10 }
 0x437   : > { %p1009_p5 = pnand %p1008_p4, %p1418_p11 }
 0x438   : > { %p1014_p3 = por %p1013_p1, %p1012_p9 }
 0x439   : > { %p1010_p7 = pneg %p1009_p5 }
 0x43a   : > { %p1016_p12 = por %p1015_p6, %p1014_p3 }
 0x43c   : > { %p1017_p13 = pnand %p1016_p12, %p1010_p7 }
 0x43e   : > { %1020 = shalt.err (!%p1017_p13)
}
 0x43f   : > { %s1068_s21 = smov 128   ;;  %s1069_s26 = smov 8  }
 0x440   : > { %872 = dma.vmem_to_hbm [thread:$0]  (%p1418_p11), %s1361_s29, 512, %s1359_s10, %s635_s2, %s1068_s21, %s1068_s21, %s1069_s26  }
 0x441 PF: > { %s663_s27 = sand.u32 1, %s1047_s14   ;;  %p1419_p8 = scmp.ne.s32.totalorder %s1416_s25, 0 }
 0x442   : > { %p1420_p10 = scmp.ge.s32.totalorder %s1059_s17, 2  ;;  %s664_s28 = scalar_lea.sflag [#allocation5], %s663_s27 }
 0x444   : > { %p879_p0 = pnand %p1420_p10, %p1419_p8 }
 0x446   : > { %1042 = dma.done.wait (!%p879_p0), %s664_s28, 512  }
 0x447   : > { %1044 = vsyncadd (!%p879_p0), %s664_s28, 4294966784  ;;  %p17_p2 = scmp.ge.s32.totalorder %s1118_s19, 4   ;;  %s1421_s14 = smov %s1051_s15 }
 0x448   : > { %s1422_s15 = smov %s1055_s16  ;;  %s1423_s16 = smov %s1130_s22 }
 0x449   : > { %s1424_s17 = smov %s1118_s19  ;;  %19 = sbr.rel (!%p17_p2) target bundleno = 7 (0x7), region = 77 }
 0x450   :  { %669 = vsyncpa [#allocation4], 1 }
 0x451   :  { %671 = vsyncpa [#allocation4 + $0x1], 1 }
 0x452   :  { %672 = vsyncpa [#allocation5], 1 }
 0x453   :  { %674 = vsyncpa [#allocation5 + $0x1], 1 }

</bundles_post_ra>
